<compile_context>
chip_gen: v7x
topology: tpu7x:2x2x1
jax: 0.10.0
libtpu: 0.0.40
codegen_flags: <defaults>
</compile_context>

<pallas_src>
import jax
import jax.numpy as jnp
from jax.experimental import pallas as pl
from jax.experimental.pallas import tpu as pltpu

EPS = 1e-5


def _round_up(v, m):
    return ((v + m - 1) // m) * m


def logistic_regression_forward(x, gamma, beta, w1, b1, w2, b2, *,
                                tile_b=2048, tile_stats=4096):
    """w1: (D, K) and w2: (K, O) are stored input-major so the kernels compute x @ W."""
    B, D = x.shape
    K = w1.shape[1]
    O = w2.shape[1]

    # tile sizes: multiples of 8 sublanes, no larger than the (rounded-up) batch
    b_cap = _round_up(B, 8)
    tile_b = max(8, min(_round_up(int(tile_b), 8), b_cap))
    tile_stats = max(8, min(_round_up(int(tile_stats), 8), b_cap))

    # ---------------- pass 1: per-feature sum / sum-of-squares ----------------
    n_stats_tiles = int(pl.cdiv(B, tile_stats))
    n_split = 2 if n_stats_tiles >= 2 else 1       # one partial accumulator per TC (v7x)
    n_per_core = int(pl.cdiv(n_stats_tiles, n_split))

    def bn_stats_kernel(x_ref, sum_ref, sqsum_ref):
        c = pl.program_id(0)
        j = pl.program_id(1)

        @pl.when(j == 0)
        def _():
            sum_ref[...] = jnp.zeros_like(sum_ref)
            sqsum_ref[...] = jnp.zeros_like(sqsum_ref)

        # Mask rows past the true batch size: the last tile may overhang B, and a
        # fully out-of-range tile of the 2-way split (odd tile count) is clamped in
        # the index_map but fully masked here, so it contributes zero either way.
        row0 = (c * n_per_core + j) * tile_stats
        rows = row0 + jax.lax.broadcasted_iota(jnp.int32, (tile_stats, D), 0)
        xv = jnp.where(rows < B, x_ref[...], 0.0)
        sum_ref[...] += jnp.sum(xv, axis=0, keepdims=True)[None]       # (1,1,D)
        sqsum_ref[...] += jnp.sum(xv * xv, axis=0, keepdims=True)[None]

    def x_stats_map(c, j):
        # clamp so an odd tile count never produces a fully out-of-bounds DMA
        return (jnp.minimum(c * n_per_core + j, n_stats_tiles - 1), 0)

    psum, psq = pl.pallas_call(
        bn_stats_kernel,
        out_shape=(jax.ShapeDtypeStruct((n_split, 1, D), jnp.float32),
                   jax.ShapeDtypeStruct((n_split, 1, D), jnp.float32)),
        grid_spec=pltpu.PrefetchScalarGridSpec(
            num_scalar_prefetch=0,
            grid=(n_split, n_per_core),
            in_specs=[pl.BlockSpec((tile_stats, D), x_stats_map)],
            out_specs=(pl.BlockSpec((1, 1, D), lambda c, j: (c, 0, 0)),
                       pl.BlockSpec((1, 1, D), lambda c, j: (c, 0, 0))),
        ),
        compiler_params=pltpu.CompilerParams(
            dimension_semantics=("parallel", "arbitrary")),
    )(x)

    xsum = jnp.sum(psum, axis=0)      # (1, D)
    xsq = jnp.sum(psq, axis=0)        # (1, D)

    # ---- fold training-mode BatchNorm1d (batch mean, biased batch var) + affine
    # ---- into the first linear:  ((x*scale)+shift) @ w1 + b1  ==  x @ w1f + b1f
    mean = xsum / B                                     # true batch size
    var = jnp.maximum(xsq / B - mean * mean, 0.0)       # clamp cancellation before rsqrt
    scale = gamma * jax.lax.rsqrt(var + EPS)            # (1, D)
    shift = beta - mean * scale                         # (1, D)
    w1f = scale.reshape(D, 1) * w1                      # (D, K)
    b1f = shift @ w1 + b1                               # (1, K)

    # ---------------- pass 2: fused linear/ReLU + linear/sigmoid ----------------
    n_tiles = int(pl.cdiv(B, tile_b))

    def logreg_kernel(x_ref, w1_ref, b1_ref, w2_ref, b2_ref, o_ref):
        h = jnp.dot(x_ref[...], w1_ref[...],
                    preferred_element_type=jnp.float32) + b1_ref[...]
        h = jnp.maximum(h, 0.0)
        z = jnp.dot(h, w2_ref[...],
                    preferred_element_type=jnp.float32) + b2_ref[...]
        # sigmoid(z) == 0.5 * (tanh(z/2) + 1): EUP op, stable for large |z|
        o_ref[...] = (0.5 * jnp.tanh(0.5 * z) + 0.5).astype(o_ref.dtype)

    out = pl.pallas_call(
        logreg_kernel,
        out_shape=jax.ShapeDtypeStruct((B, O), jnp.float32),
        grid_spec=pltpu.PrefetchScalarGridSpec(
            num_scalar_prefetch=0,
            grid=(n_tiles,),
            in_specs=[
                pl.BlockSpec((tile_b, D), lambda i: (i, 0)),   # x: batch-tiled
                pl.BlockSpec((D, K), lambda i: (0, 0)),        # BN-folded w1 (VMEM-resident)
                pl.BlockSpec((1, K), lambda i: (0, 0)),        # BN-folded b1 (resident)
                pl.BlockSpec((K, O), lambda i: (0, 0)),        # w2 (resident)
                pl.BlockSpec((1, O), lambda i: (0, 0)),        # b2 (resident)
            ],
            out_specs=pl.BlockSpec((tile_b, O), lambda i: (i, 0)),
        ),
        compiler_params=pltpu.CompilerParams(
            # batch tiles are independent once BN stats are folded -> megacore sharding
            dimension_semantics=("parallel",)),
    )(x, w1f, b1f, w2, b2)

    return out


# TODO(synk): dropout (inactive by default: dropout=None) and the n_layers>1 / last_layer /
# logits branches are not exercised with the default constructor args and are omitted.

if __name__ == "__main__":
    key = jax.random.PRNGKey(0)
    B, input_dim, output_dim = 200, 32, 4   # B not a tile multiple -> exercises ragged tiles
    intermed = input_dim                    # bottleneck=None -> intermed = input_dim

    k_x, k_w1, k_b1, k_w2, k_b2 = jax.random.split(key, 5)

    x = jax.random.normal(k_x, (B, input_dim), dtype=jnp.float32)

    # BatchNorm1d affine params (PyTorch init: weight=1, bias=0)
    gamma = jnp.ones((1, input_dim), dtype=jnp.float32)
    beta = jnp.zeros((1, input_dim), dtype=jnp.float32)

    # Linear params (PyTorch-style uniform bounds), stored input-major so kernels do x @ W.
    bnd1 = 1.0 / float(jnp.sqrt(input_dim))
    w1 = jax.random.uniform(k_w1, (input_dim, intermed), jnp.float32, -bnd1, bnd1)
    b1 = jax.random.uniform(k_b1, (1, intermed), jnp.float32, -bnd1, bnd1)

    bnd2 = 1.0 / float(jnp.sqrt(intermed))
    w2 = jax.random.uniform(k_w2, (intermed, output_dim), jnp.float32, -bnd2, bnd2)
    b2 = jax.random.uniform(k_b2, (1, output_dim), jnp.float32, -bnd2, bnd2)

    # small tiles here on purpose: exercises the ragged last tile, the in-kernel row mask
    # and the 2-way stats split; production defaults are tile_b=2048 / tile_stats=4096.
    out = logistic_regression_forward(x, gamma, beta, w1, b1, w2, b2,
                                      tile_b=128, tile_stats=64)
    jax.block_until_ready(out)

    # Pure-JAX reference (training-mode BatchNorm1d: batch mean, biased batch variance)
    mean = jnp.mean(x, axis=0, keepdims=True)
    var = jnp.mean((x - mean) ** 2, axis=0, keepdims=True)
    xn = (x - mean) / jnp.sqrt(var + EPS) * gamma + beta
    h = jnp.maximum(xn @ w1 + b1, 0.0)
    ref = jax.nn.sigmoid(h @ w2 + b2)

    assert out.shape == ref.shape, f"shape mismatch {out.shape} vs {ref.shape}"
    assert jnp.allclose(out, ref, atol=1e-4, rtol=1e-4), (
        f"mismatch vs reference: max abs diff {jnp.max(jnp.abs(out - ref))}")
    print("KERNEL_OK")
</pallas_src>

<mosaic_0001>
module attributes {stable_mosaic.version = 11 : i64} {
  func.func @bn_stats_kernel(%arg0: i32, %arg1: i32, %arg2: memref<64x32xf32, #tpu.memory_space<vmem>>, %arg3: memref<1x1x32xf32, #tpu.memory_space<vmem>>, %arg4: memref<1x1x32xf32, #tpu.memory_space<vmem>>) attributes {dimension_semantics = [#tpu.dimension_semantics<parallel>, #tpu.dimension_semantics<arbitrary>], iteration_bounds = array<i64: 2, 2>, scalar_prefetch = 0 : i64, scratch_operands = 0 : i64, tpu.core_type = #tpu.core_type<tc>, window_params = [{transform_indices = @transform_0, window_bounds = array<i64: 64, 32>}, {transform_indices = @transform_1, window_bounds = array<i64: 1, 1, 32>}, {transform_indices = @transform_2, window_bounds = array<i64: 1, 1, 32>}]} {
    %c0_i32 = arith.constant 0 : i32
    %0 = arith.cmpi eq, %arg1, %c0_i32 : i32
    %1 = arith.extui %0 : i1 to i32
    %c0_i32_0 = arith.constant 0 : i32
    %2 = arith.cmpi ne, %1, %c0_i32_0 : i32
    scf.if %2 {
      %cst_16 = arith.constant 0.000000e+00 : f32
      %27 = vector.broadcast %cst_16 : f32 to vector<1x1x32xf32>
      %c0_17 = arith.constant 0 : index
      %c0_18 = arith.constant 0 : index
      %c0_19 = arith.constant 0 : index
      %28 = vector.load %arg3[%c0_17, %c0_18, %c0_19] : memref<1x1x32xf32, #tpu.memory_space<vmem>>, vector<1x1x32xf32>
      tpu.vector_store %arg3[%c0_17, %c0_18, %c0_19], %27 {strides = array<i32>} : memref<1x1x32xf32, #tpu.memory_space<vmem>>, vector<1x1x32xf32>,
      %cst_20 = arith.constant 0.000000e+00 : f32
      %29 = vector.broadcast %cst_20 : f32 to vector<1x1x32xf32>
      %c0_21 = arith.constant 0 : index
      %c0_22 = arith.constant 0 : index
      %c0_23 = arith.constant 0 : index
      %30 = vector.load %arg4[%c0_21, %c0_22, %c0_23] : memref<1x1x32xf32, #tpu.memory_space<vmem>>, vector<1x1x32xf32>
      tpu.vector_store %arg4[%c0_21, %c0_22, %c0_23], %29 {strides = array<i32>} : memref<1x1x32xf32, #tpu.memory_space<vmem>>, vector<1x1x32xf32>,
    } else {
    }
    %c2_i32 = arith.constant 2 : i32
    %3 = arith.muli %arg0, %c2_i32 : i32
    %4 = arith.addi %3, %arg1 : i32
    %c64_i32 = arith.constant 64 : i32
    %5 = arith.muli %4, %c64_i32 : i32
    %6 = tpu.iota {dimensions = array<i32: 0>} : vector<64x32xi32>
    %7 = vector.broadcast %5 : i32 to vector<64x32xi32>
    %8 = arith.addi %7, %6 : vector<64x32xi32>
    %c200_i32 = arith.constant 200 : i32
    %9 = vector.broadcast %c200_i32 : i32 to vector<64x32xi32>
    %10 = arith.cmpi slt, %8, %9 : vector<64x32xi32>
    %c0 = arith.constant 0 : index
    %c0_1 = arith.constant 0 : index
    %11 = vector.load %arg2[%c0, %c0_1] : memref<64x32xf32, #tpu.memory_space<vmem>>, vector<64x32xf32>
    %cst = arith.constant 0.000000e+00 : f32
    %12 = vector.broadcast %cst : f32 to vector<64x32xf32>
    %13 = arith.select %10, %11, %12 : vector<64x32xi1>, vector<64x32xf32>
    %c0_2 = arith.constant 0 : index
    %c0_3 = arith.constant 0 : index
    %c0_4 = arith.constant 0 : index
    %14 = vector.load %arg3[%c0_2, %c0_3, %c0_4] : memref<1x1x32xf32, #tpu.memory_space<vmem>>, vector<1x1x32xf32>
    %cst_5 = arith.constant dense<0.000000e+00> : vector<32xf32>
    %15 = vector.multi_reduction <add>, %13, %cst_5 [0] : vector<64x32xf32> to vector<32xf32>
    %16 = vector.shape_cast %15 : vector<32xf32> to vector<1x32xf32>
    %17 = vector.shape_cast %16 : vector<1x32xf32> to vector<1x1x32xf32>
    %18 = arith.addf %14, %17 : vector<1x1x32xf32>
    %c0_6 = arith.constant 0 : index
    %c0_7 = arith.constant 0 : index
    %c0_8 = arith.constant 0 : index
    %19 = vector.load %arg3[%c0_6, %c0_7, %c0_8] : memref<1x1x32xf32, #tpu.memory_space<vmem>>, vector<1x1x32xf32>
    tpu.vector_store %arg3[%c0_6, %c0_7, %c0_8], %18 {strides = array<i32>} : memref<1x1x32xf32, #tpu.memory_space<vmem>>, vector<1x1x32xf32>,
    %c0_9 = arith.constant 0 : index
    %c0_10 = arith.constant 0 : index
    %c0_11 = arith.constant 0 : index
    %20 = vector.load %arg4[%c0_9, %c0_10, %c0_11] : memref<1x1x32xf32, #tpu.memory_space<vmem>>, vector<1x1x32xf32>
    %21 = arith.mulf %13, %13 : vector<64x32xf32>
    %cst_12 = arith.constant dense<0.000000e+00> : vector<32xf32>
    %22 = vector.multi_reduction <add>, %21, %cst_12 [0] : vector<64x32xf32> to vector<32xf32>
    %23 = vector.shape_cast %22 : vector<32xf32> to vector<1x32xf32>
    %24 = vector.shape_cast %23 : vector<1x32xf32> to vector<1x1x32xf32>
    %25 = arith.addf %20, %24 : vector<1x1x32xf32>
    %c0_13 = arith.constant 0 : index
    %c0_14 = arith.constant 0 : index
    %c0_15 = arith.constant 0 : index
    %26 = vector.load %arg4[%c0_13, %c0_14, %c0_15] : memref<1x1x32xf32, #tpu.memory_space<vmem>>, vector<1x1x32xf32>
    tpu.vector_store %arg4[%c0_13, %c0_14, %c0_15], %25 {strides = array<i32>} : memref<1x1x32xf32, #tpu.memory_space<vmem>>, vector<1x1x32xf32>,
    return
  }
  func.func @transform_0(%arg0: i32, %arg1: i32) -> (i32, i32) {
    %c2_i32 = arith.constant 2 : i32
    %0 = arith.muli %arg0, %c2_i32 : i32
    %1 = arith.addi %0, %arg1 : i32
    %c3_i32 = arith.constant 3 : i32
    %2 = arith.minsi %1, %c3_i32 : i32
    %c0_i32 = arith.constant 0 : i32
    %c0_i32_0 = arith.constant 0 : i32
    return %2, %c0_i32 : i32, i32
  }
  func.func @transform_1(%arg0: i32, %arg1: i32) -> (i32, i32, i32) {
    %c0_i32 = arith.constant 0 : i32
    %c0_i32_0 = arith.constant 0 : i32
    %c0_i32_1 = arith.constant 0 : i32
    return %arg0, %c0_i32, %c0_i32_0 : i32, i32, i32
  }
  func.func @transform_2(%arg0: i32, %arg1: i32) -> (i32, i32, i32) {
    %c0_i32 = arith.constant 0 : i32
    %c0_i32_0 = arith.constant 0 : i32
    %c0_i32_1 = arith.constant 0 : i32
    return %arg0, %c0_i32, %c0_i32_0 : i32, i32, i32
  }
}

</mosaic_0001>

<bundles_post_ra>
// kernel: tpu_custom_call.1
= control target key start
LH: loop header
LB: loop body
LE: loop exit
PB: predicated region body
PF: predicated region fallthrough
CT: control target
= control target key end

     0   :  { %8 = vsyncpa [#allocation3], 0  ;;  %s901_s0 = inlined_call_operand.vmem [shape: f32[200,32], index: 0, kind: input, shape index: {}]   ;;  %s902_s1 = inlined_call_operand.hbm [shape: f32[2,1,32], index: 1, kind: output, shape index: {0}]   ;;  %s903_s2 = inlined_call_operand.hbm [shape: f32[2,1,32], index: 2, kind: output, shape index: {1}]  }
   0x1   :  { %10 = vsyncpa [#allocation3 + $0x1], 0 }
   0x2   :  { %11 = vsyncpa [#allocation5], 0 }
   0x3   :  { %13 = vsyncpa [#allocation5 + $0x1], 0  ;;  %s687_s9 = smov 0   ;;  %s689_s10 = smov 0  }
   0x4   :  { %s691_s11 = smov 0   ;;  %s693_s12 = smov 0  }
   0x5   :  { %s695_s13 = smov 0   ;;  %s697_s14 = smov 0  }
   0x6   :  { %s699_s15 = smov 0   ;;  %s701_s16 = smov 0  }
   0x7 LB: > { %s447_s17 = sadd.s32 4294967295, %s667_s16   ;;  %s448_s18 = sadd.s32 4294967294, %s667_s16   ;;  %s667_s16 = sphi %s701_s16, %s19_s16   ;;  %s663_s15 = sphi %s699_s15, %s912_s15   ;;  %s659_s14 = sphi %s697_s14, %s911_s14   ;;  %s655_s13 = sphi %s695_s13, %s910_s13   ;;  %s651_s12 = sphi %s693_s12, %s909_s12   ;;  %s647_s11 = sphi %s691_s11, %s908_s11   ;;  %s643_s10 = sphi %s689_s10, %s907_s10   ;;  %s639_s9 = sphi %s687_s9, %s906_s9  }
   0x8   : > { %s28_s19 = sadd.s32 1, %s659_s14  ;;  %s31_s20 = sadd.s32 1, %s663_s15 }
   0x9   : > { %p29_p0 = scmp.ge.s32.totalorder %s28_s19, 2  ;;  %p82_p1 = scmp.ne.s32.totalorder %s647_s11, %s643_s10 }
   0xa   : > { %p83_p2 = scmp.eq.s32.totalorder %s447_s17, 3  ;;  %p88_p4 = scmp.ne.s32.totalorder %s643_s10, %s639_s9 }
   0xb   : > { %s914_s19 = smov (%p29_p0, %s28_s19), 0  ;;  %s916_s20 = smov (!%p29_p0, %s31_s20), %s663_s15 }
   0xc   : > { %p736_p3 = por %p83_p2, %p82_p1  ;;  %p33_p5 = scmp.ge.s32.totalorder %s916_s20, 2 }
   0xd   : > { %p89_p6 = scmp.eq.s32.totalorder %s448_s18, 3  ;;  %p453_p7 = scmp.ge.s32.totalorder %s667_s16, 1 }
   0xe   : > { %p158_p8 = scmp.lt.s32.totalorder %s667_s16, 5  ;;  %s918_s20 = smov (%p33_p5, %s916_s20), 0 }
   0xf   : > { %p746_p9 = por %p89_p6, %p88_p4  ;;  %s69_s23 = ssub.s32 %s663_s15, %s918_s20 }
  0x10   : > { %p159_p10 = pnand %p453_p7, %p158_p8  ;;  %s72_s24 = sadd.s32 1, %s647_s11 }
  0x11   : > { %p70_p11 = scmp.eq.s32.totalorder %s69_s23, 0  ;;  %s757_s26 = sand.u32 (!%p159_p10), 1, %s643_s10  }
  0x12   : > { %162 = sbr.rel (%p159_p10) target bundleno = 109 (0x6d), region = 24  ;;  %s454_s27 = sshll.u32 (!%p159_p10), %s655_s13, 1 }
  0x13   : > { %s754_s25 = scalar_select %p70_p11, %s647_s11, %s72_s24  }
  0x14   : > { %s192_s28 = sadd.s32 (!%p159_p10), %s651_s12, %s454_s27  ;;  %s767_s7 = scalar_lea.vmem (!%p159_p10), [#allocation2], %s757_s26 }
  0x15   : > { %p193_p12 = scmp.lt.s32.totalorder (!%p159_p10), %s192_s28, 3  ;;  %s770_s8 = scalar_lea.vmem (!%p159_p10), [#allocation4], %s757_s26 }
  0x16   : > { %p457_p0 = scmp.ne.s32.totalorder (!%p159_p10), %s651_s12, 0 }
  0x19   : > { %s194_s29 = scalar_select %p193_p12, %s192_s28, 3 }
  0x1a   : > { %216 = sbr.rel (%p457_p0) target bundleno = 33 (0x21), region = 28  ;;  %vm217_vm0 = vcmask (!%p457_p0), 253952   ;;  %v669_v0 = vmov (!%p457_p0), 0.0  }
  0x1b   : > { %s455_s30 = sshll.u32 %s194_s29, 3  ;;  %218 = vst.msk [vmem:[%s767_s7] sm:$0x1] (!%p457_p0), %vm217_vm0, %v669_v0  ;;  %219 = vst.msk [vmem:[%s770_s8] sm:$0x1] (!%p457_p0), %vm217_vm0, %v669_v0 }
  0x1c   : > { %p200_p13 = scmp.lt.s32.totalorder %s455_s30, 24 }
  0x1e   : > { %s920_s30 = smov (!%p200_p13, %s455_s30), 24 }
  0x1f   : > { %s456_s3 = sshll.u32 %s920_s30, 3 }
  0x20   : > { %s764_s6 = scalar_lea.vmem %s901_s0, %s456_s3 }
  0x21 PF: > { %s459_s17 = sshll.u32 %s192_s28, 6  ;;  %v223_v1 = vlaneseq  ;;  %v249_v16 = vld [vmem:[%s764_s6] sm:$0xff]  ;;  %vm266_vm2 = vcmask 261120   ;;  %v250_v18 = vld [vmem:[%s764_s6 + $0x8] sm:$0xff]  ;;  %v251_v19 = vld [vmem:[%s764_s6 + $0x10] sm:$0xff]  ;;  %s460_s12 = sshll.u32 %s655_s13, 4 }
  0x22   : > { %v232_v3 = vstv %s459_s17  ;;  %v252_v20 = vld [vmem:[%s764_s6 + $0x18] sm:$0xff]  ;;  %v253_v23 = vld [vmem:[%s764_s6 + $0x20] sm:$0xff]  ;;  %v254_v29 = vld [vmem:[%s764_s6 + $0x28] sm:$0xff]  ;;  %s340_s18 = sshll.u32 %s767_s7, 4  ;;  %vm289_vm10 = vcmask 253952   ;;  %s808_s27 = scalar_lea.hbm %s902_s1, %s460_s12  ;;  %s810_s18 = int_to_ptr.vmem [resolvable:$true] %s340_s18 }
  0x23   : > { %v224_v2 = vshrl.u32 %v223_v1, 7  ;;  %v255_v35 = vld [vmem:[%s764_s6 + $0x30] sm:$0xff]  ;;  %v256_v43 = vld [vmem:[%s764_s6 + $0x38] sm:$0xff]  ;;  %s353_s28 = sshll.u32 %s770_s8, 4  ;;  %s324_s29 = scalar_lea.sflag [#allocation3], %s757_s26  ;;  %s847_s28 = int_to_ptr.vmem [resolvable:$true] %s353_s28 }
  0x24   : > { %s541_s30 = scalar_lea.vmem %s810_s18, 16  ;;  %s670_s3 = smov [#allocation2]  }
  0x25   : > { %v225_v4 = vadd.s32 8, %v224_v2  ;;  %v226_v5 = vadd.s32 16, %v224_v2  ;;  %v227_v6 = vadd.s32 24, %v224_v2  ;;  %v228_v7 = vadd.s32 32, %v224_v2  ;;  %p542_p1 = scmp.ne.s32.totalorder %s810_s18, %s541_s30  ;;  %s545_s4 = sshll.u32 %s670_s3, 4  ;;  %s546_s4 = int_to_ptr.vmem [resolvable:$false] %s545_s4 }
  0x26   : > { %v229_v8 = vadd.s32 40, %v224_v2  ;;  %v230_v9 = vadd.s32 48, %v224_v2  ;;  %v231_v10 = vadd.s32 56, %v224_v2  ;;  %v233_v11 = vadd.s32 %v232_v3, %v224_v2  ;;  %s547_s5 = scalar_lea.vmem %s546_s4, 32  ;;  %p548_p5 = scmp.lt.s32.totalorder %s810_s18, %s546_s4 }
  0x27   : > { %v234_v12 = vadd.s32 %v232_v3, %v225_v4  ;;  %v235_v13 = vadd.s32 %v232_v3, %v226_v5  ;;  %v236_v14 = vadd.s32 %v232_v3, %v227_v6  ;;  %v237_v15 = vadd.s32 %v232_v3, %v228_v7  ;;  %p543_p2 = pnand %p542_p1, %p736_p3  ;;  %p549_p6 = scmp.lt.s32.totalorder %s547_s5, %s541_s30 }
  0x28   : > { %vm241_vm1 = vcmp.lt.s32.totalorder %v233_v11, 200  ;;  %v238_v17 = vadd.s32 %v232_v3, %v229_v8  ;;  %v239_v21 = vadd.s32 %v232_v3, %v230_v9  ;;  %v240_v22 = vadd.s32 %v232_v3, %v231_v10 }
  0x29   : > { %vm242_vm3 = vcmp.lt.s32.totalorder %v234_v12, 200  ;;  %vm243_vm4 = vcmp.lt.s32.totalorder %v235_v13, 200  ;;  %vm244_vm5 = vcmp.lt.s32.totalorder %v236_v14, 200  ;;  %vm245_vm6 = vcmp.lt.s32.totalorder %v237_v15, 200  ;;  %p544_p4 = pneg %p543_p2  ;;  %p550_p7 = por %p549_p6, %p548_p5 }
  0x2a   : > { %v257_v24 = vsel %vm241_vm1, %v249_v16, 0.0  ;;  %v258_v25 = vsel %vm242_vm3, %v250_v18, 0.0  ;;  %v259_v26 = vsel %vm243_vm4, %v251_v19, 0.0  ;;  %v260_v27 = vsel %vm244_vm5, %v252_v20, 0.0 }
  0x2b   : > { %v267_v28 = vsel %vm266_vm2, %v257_v24, 0.0  ;;  %vm246_vm7 = vcmp.lt.s32.totalorder %v238_v17, 200  ;;  %v268_v30 = vsel %vm266_vm2, %v258_v25, 0.0  ;;  %v270_v31 = vsel %vm266_vm2, %v259_v26, 0.0  ;;  %v265_v17 = vld [vmem:[%s767_s7] sm:$0x1]  ;;  %p551_p8 = pnand %p550_p7, %p544_p4 }
  0x2c   : > { %vm247_vm8 = vcmp.lt.s32.totalorder %v239_v21, 200  ;;  %v261_v32 = vsel %vm245_vm6, %v253_v23, 0.0  ;;  %v269_v33 = vadd.f32 %v268_v30, %v267_v28  ;;  %v272_v34 = vsel %vm266_vm2, %v260_v27, 0.0 }
  0x2d   : > { %v292_v36 = vmul.f32 %v257_v24, %v257_v24  ;;  %v293_v37 = vmul.f32 %v258_v25, %v258_v25  ;;  %v294_v38 = vmul.f32 %v259_v26, %v259_v26  ;;  %v295_v39 = vmul.f32 %v260_v27, %v260_v27 }
  0x2e   : > { %vm248_vm9 = vcmp.lt.s32.totalorder %v240_v22, 200  ;;  %v262_v40 = vsel %vm246_vm7, %v254_v29, 0.0  ;;  %v271_v41 = vadd.f32 %v270_v31, %v269_v33  ;;  %v274_v42 = vsel %vm266_vm2, %v261_v32, 0.0  ;;  %v291_v22 = vld [vmem:[%s770_s8] sm:$0x1] }
  0x2f   : > { %v296_v44 = vmul.f32 %v261_v32, %v261_v32  ;;  %v300_v45 = vsel %vm266_vm2, %v292_v36, 0.0  ;;  %v301_v46 = vsel %vm266_vm2, %v293_v37, 0.0  ;;  %v303_v47 = vsel %vm266_vm2, %v294_v38, 0.0 }
  0x30   : > { %v263_v48 = vsel %vm247_vm8, %v255_v35, 0.0  ;;  %v273_v49 = vadd.f32 %v272_v34, %v271_v41  ;;  %v302_v50 = vadd.f32 %v301_v46, %v300_v45  ;;  %v276_v51 = vsel %vm266_vm2, %v262_v40, 0.0 }
  0x31   : > { %v297_v52 = vmul.f32 %v262_v40, %v262_v40  ;;  %v305_v53 = vsel %vm266_vm2, %v295_v39, 0.0  ;;  %v264_v54 = vsel %vm248_vm9, %v256_v43, 0.0  ;;  %v278_v57 = vsel %vm266_vm2, %v263_v48, 0.0 }
  0x32   : > { %v275_v55 = vadd.f32 %v274_v42, %v273_v49  ;;  %v304_v56 = vadd.f32 %v303_v47, %v302_v50  ;;  %v298_v58 = vmul.f32 %v263_v48, %v263_v48  ;;  %v307_v59 = vsel %vm266_vm2, %v296_v44, 0.0 }
  0x33   : > { %v280_v62 = vsel %vm266_vm2, %v264_v54, 0.0  ;;  %v299_v63 = vmul.f32 %v264_v54, %v264_v54  ;;  %v309_v0 = vsel %vm266_vm2, %v297_v52, 0.0 }
  0x34   : > { %v277_v60 = vadd.f32 %v276_v51, %v275_v55  ;;  %v306_v61 = vadd.f32 %v305_v53, %v304_v56  ;;  %v311_v3 = vsel %vm266_vm2, %v298_v58, 0.0 }
  0x35   : > { %v313_v6 = vsel %vm266_vm2, %v299_v63, 0.0 }
  0x36   : > { %v279_v1 = vadd.f32 %v278_v57, %v277_v60  ;;  %v308_v2 = vadd.f32 %v307_v59, %v306_v61 }
  0x38   : > { %v281_v4 = vadd.f32 %v280_v62, %v279_v1  ;;  %v310_v5 = vadd.f32 %v309_v0, %v308_v2 }
  0x3a   : > { %v282_v7 = vrot.slane %v281_v4, 4  ;;  %v312_v8 = vadd.f32 %v311_v3, %v310_v5 }
  0x3c   : > { %v283_v9 = vadd.f32 %v282_v7, %v281_v4  ;;  %v314_v10 = vadd.f32 %v313_v6, %v312_v8 }
  0x3e   : > { %v284_v11 = vrot.slane %v283_v9, 2  ;;  %v315_v12 = vrot.slane %v314_v10, 4 }
  0x40   : > { %v285_v13 = vadd.f32 %v284_v11, %v283_v9  ;;  %v316_v14 = vadd.f32 %v315_v12, %v314_v10 }
  0x42   : > { %v286_v15 = vrot.slane %v285_v13, 1  ;;  %v317_v16 = vrot.slane %v316_v14, 2 }
  0x44   : > { %v287_v18 = vadd.f32 %v286_v15, %v285_v13  ;;  %v318_v19 = vadd.f32 %v317_v16, %v316_v14 }
  0x46   : > { %v288_v20 = vadd.f32 %v287_v18, %v265_v17  ;;  %v319_v21 = vrot.slane %v318_v19, 1 }
  0x48   : > { %290 = vst.msk [vmem:[%s767_s7] sm:$0x1] %vm289_vm10, %v288_v20  ;;  %v320_v23 = vadd.f32 %v319_v21, %v318_v19 }
  0x49   : > { %554 = shalt.err (!%p551_p8)
}
  0x4a   : > { %s555_s6 = scalar_lea.hbm %s808_s27, 16  ;;  %s559_s23 = scalar_lea.hbm %s902_s1, 32 }
  0x4b   : > { %p556_p10 = scmp.ne.s32.totalorder %s808_s27, %s555_s6  ;;  %p560_p13 = scmp.lt.u32.totalorder %s808_s27, %s902_s1 }
  0x4c   : > { %p561_p0 = scmp.lt.u32.totalorder %s559_s23, %s555_s6  ;;  %p563_p2 = scmp.lt.u32.totalorder %s555_s6, %s808_s27 }
  0x4d   : > { %p557_p11 = pnand %p556_p10, %p736_p3 }
  0x4e   : > { %p562_p1 = por %p561_p0, %p560_p13 }
  0x4f   : > { %p558_p12 = pneg %p557_p11 }
  0x50   : > { %p564_p4 = por %p563_p2, %p562_p1 }
  0x52   : > { %p565_p5 = pnand %p564_p4, %p558_p12 }
  0x54   : > { %568 = shalt.err (!%p565_p5)
}
  0x55   : > { %464 = dma.vmem_to_hbm [thread:$0]  (%p736_p3), %s810_s18, 16, %s808_s27, %s324_s29   ;;  %v321_v24 = vadd.f32 %v320_v23, %v291_v22 }
  0x56   : > { %s843_s5 = scalar_lea.hbm %s903_s2, %s460_s12  ;;  %s328_s6 = scalar_lea.sflag [#allocation5], %s757_s26 }
  0x57   : > { %322 = vst.msk [vmem:[%s770_s8] sm:$0x1] %vm289_vm10, %v321_v24  ;;  %s569_s7 = scalar_lea.vmem %s847_s28, 16  ;;  %s671_s13 = smov [#allocation4]  }
  0x58   : > { %p570_p6 = scmp.ne.s32.totalorder %s847_s28, %s569_s7  ;;  %s573_s18 = sshll.u32 %s671_s13, 4  ;;  %s574_s18 = int_to_ptr.vmem [resolvable:$false] %s573_s18 }
  0x59   : > { %s575_s27 = scalar_lea.vmem %s574_s18, 32  ;;  %p576_p10 = scmp.lt.s32.totalorder %s847_s28, %s574_s18 }
  0x5a   : > { %p571_p7 = pnand %p570_p6, %p736_p3  ;;  %p577_p11 = scmp.lt.s32.totalorder %s575_s27, %s569_s7 }
  0x5c   : > { %p572_p8 = pneg %p571_p7  ;;  %p578_p12 = por %p577_p11, %p576_p10 }
  0x5e   : > { %p579_p13 = pnand %p578_p12, %p572_p8 }
  0x60   : > { %582 = shalt.err (!%p579_p13)
}
  0x61   : > { %s583_s26 = scalar_lea.hbm %s843_s5, 16  ;;  %s587_s29 = scalar_lea.hbm %s903_s2, 32 }
  0x62   : > { %p584_p0 = scmp.ne.s32.totalorder %s843_s5, %s583_s26  ;;  %p588_p4 = scmp.lt.u32.totalorder %s843_s5, %s903_s2 }
  0x63   : > { %p589_p5 = scmp.lt.u32.totalorder %s587_s29, %s583_s26  ;;  %p591_p7 = scmp.lt.u32.totalorder %s583_s26, %s843_s5 }
  0x64   : > { %p585_p1 = pnand %p584_p0, %p736_p3 }
  0x65   : > { %p590_p6 = por %p589_p5, %p588_p4 }
  0x66   : > { %p586_p2 = pneg %p585_p1 }
  0x67   : > { %p592_p8 = por %p591_p7, %p590_p6 }
  0x69   : > { %p593_p10 = pnand %p592_p8, %p586_p2 }
  0x6b   : > { %596 = shalt.err (!%p593_p10)
}
  0x6c   : > { %465 = dma.vmem_to_hbm [thread:$0]  (%p736_p3), %s847_s28, 16, %s843_s5, %s328_s6  }
  0x6d PF: > { %p475_p11 = scmp.ge.s32.totalorder %s667_s16, 2  ;;  %s365_s24 = sand.u32 1, %s639_s9  }
  0x6e   : > { %s366_s3 = scalar_lea.sflag [#allocation3], %s365_s24 }
  0x6f   : > { %p469_p12 = pnand %p475_p11, %p746_p9 }
  0x71   : > { %630 = dma.done.wait (!%p469_p12), %s366_s3, 16  }
  0x72   : > { %632 = vsyncadd (!%p469_p12), %s366_s3, 4294967280  ;;  %s374_s30 = scalar_lea.sflag [#allocation5], %s365_s24 }
  0x73   : > { %634 = dma.done.wait (!%p469_p12), %s374_s30, 16  }
  0x74   : > { %636 = vsyncadd (!%p469_p12), %s374_s30, 4294967280  ;;  %s19_s16 = sadd.s32 1, %s667_s16   ;;  %s906_s9 = smov %s643_s10 }
  0x75   : > { %p16_p13 = scmp.ge.s32.totalorder %s19_s16, 6   ;;  %s907_s10 = smov %s647_s11 }
  0x76   : > { %s908_s11 = smov %s754_s25  ;;  %s909_s12 = smov %s659_s14 }
  0x77   : > { %s910_s13 = smov %s663_s15  ;;  %s911_s14 = smov %s914_s19 }
  0x78   : > { %s912_s15 = smov %s918_s20  ;;  %18 = sbr.rel (!%p16_p13) target bundleno = 7 (0x7), region = 80 }
  0x7f   :  { %378 = vsyncpa [#allocation3], 1 }
  0x80   :  { %380 = vsyncpa [#allocation3 + $0x1], 1 }
  0x81   :  { %381 = vsyncpa [#allocation5], 1 }
  0x82   :  { %383 = vsyncpa [#allocation5 + $0x1], 1 }

</bundles_post_ra>
